<compile_context>
chip_gen: v5e
topology: v5e:2x2
jax: 0.10.0
libtpu: 0.0.40
codegen_flags: <defaults>
</compile_context>

<pallas_src>
import functools

import numpy as np
import jax
import jax.numpy as jnp
from jax.experimental import pallas as pl
from jax.experimental.pallas import tpu as pltpu


# ---------------------------------------------------------------------------
# Pallas kernel: fused im2col slab in VMEM + ONE MXU matmul per grid step
# ---------------------------------------------------------------------------

def _fused_conv_kernel(x_ref, w_ref, b_ref, hmask_ref, o_ref,
                       xpad_ref, slab_ref,
                       *, ks, pad, width, hw, nb, cin, kpad, l0):
    """nb images per grid step.

    x_ref     : (nb, Cin, hw)          flattened images (original dtype)
    w_ref     : (Cout, ks*ks*kpad)     single tap-major weight panel (compute dtype)
    b_ref     : (Cout, 1)              bias (f32)
    hmask_ref : (ks, hw)               per-kw column-validity masks (0/1, f32)
    o_ref     : (nb, Cout, hw)         lane-dense output slab (out dtype)
    xpad_ref  : (nb, Cin, l0+hw+lpad)  VMEM zero-haloed staging buffer (f32)
    slab_ref  : (ks*ks*kpad, nb*hw)    VMEM fused-im2col slab (f32)
    """
    cout = o_ref.shape[1]

    # Re-zero scratch every step: megacore-safe (no reliance on pid==0 running
    # on every core) and guarantees the halo / channel-pad rows are zero.
    xpad_ref[...] = jnp.zeros_like(xpad_ref)
    slab_ref[...] = jnp.zeros_like(slab_ref)

    # Stage each image into the haloed buffer; the data region starts at the
    # 128-aligned lane offset l0, so this store is lane-dense.
    for b in range(nb):
        xpad_ref[b, :, l0:l0 + hw] = x_ref[b].astype(xpad_ref.dtype)

    # Fused im2col: element p of a tap slice is input pixel
    # (i+kh-pad, j+kw-pad) for output pixel p = i*width + j.  Vertical
    # out-of-range taps land in the zero halo; columns whose horizontal
    # neighbour wrapped into the adjacent row are zeroed by hmask (folded
    # into the same copy, no second read-modify-write of the slab).
    for kh in range(ks):
        for kw in range(ks):
            t = kh * ks + kw
            start = l0 + (kh - pad) * width + (kw - pad)
            for b in range(nb):
                piece = xpad_ref[b, :, start:start + hw]            # (Cin, hw)
                if kw != pad:
                    piece = piece * hmask_ref[kw:kw + 1, :]
                slab_ref[t * kpad:t * kpad + cin,
                         b * hw:(b + 1) * hw] = piece

    # ONE matmul: (Cout, K) x (K, nb*hw), K = ks*ks*kpad, f32 accumulation.
    slab = slab_ref[...].astype(w_ref.dtype)
    res = jnp.dot(w_ref[...], slab, preferred_element_type=jnp.float32)
    res = res + b_ref[...]                                           # f32 epilogue

    # Lane-dense stores (hw is a multiple of 128 for the supported shapes).
    for b in range(nb):
        o_ref[b] = res[:, b * hw:(b + 1) * hw].astype(o_ref.dtype)


# ---------------------------------------------------------------------------
# Block-batch heuristic: wide lanes, but keep >=2 parallel steps for v7x
# ---------------------------------------------------------------------------

def _pick_block_batch(n, hw):
    nb = 1
    while n % (nb * 2) == 0 and n // (nb * 2) >= 2 and nb * hw < 512:
        nb *= 2
    return nb


# ---------------------------------------------------------------------------
# Jitted forward: free reshapes + tiny weight panel prep + pallas_call
# ---------------------------------------------------------------------------

@functools.partial(jax.jit, static_argnames=("pad", "compute_dtype", "out_dtype"))
def _conv2d_same_forward(x_nchw, weight, bias, *, pad, compute_dtype, out_dtype):
    n, cin, h, w = x_nchw.shape
    cout, cin_w, ks, ks2 = weight.shape
    assert cin == cin_w and ks == ks2 and ks % 2 == 1 and pad == ks // 2

    hw = h * w
    lpad = pad * (w + 1)                  # worst-case flat halo extent
    l0 = -(-lpad // 128) * 128            # 128-aligned data offset in VMEM halo buffer
    p_len = l0 + hw + lpad
    kpad = -(-cin // 8) * 8               # channels per tap, padded to sublane tile
    kdim = ks * ks * kpad
    nb = _pick_block_batch(n, hw)

    # Spatial flatten is free and stays channel-major (no transposes anywhere).
    x_flat = x_nchw.reshape(n, cin, hw)

    # Single (Cout, ks*ks*kpad) tap-major weight panel, channel-padded with 0.
    w_taps = jnp.transpose(weight, (2, 3, 0, 1)).reshape(ks * ks, cout, cin)
    w_taps = jnp.pad(w_taps, ((0, 0), (0, 0), (0, kpad - cin)))
    w_panel = (jnp.transpose(w_taps, (1, 0, 2))
               .reshape(cout, kdim).astype(compute_dtype))
    b2 = bias.reshape(cout, 1).astype(jnp.float32)

    # Horizontal row-wrap validity masks (trace-time numpy, tiny).  Kept as a
    # ~1 KiB broadcast input rather than in-kernel iota%W so the kernel never
    # relies on integer mod lowering for arbitrary W.
    col = np.arange(hw) % w
    hmask = np.stack([((col >= (pad - kw)) & (col < (w + pad - kw)))
                      .astype(np.float32) for kw in range(ks)])
    hmask = jnp.asarray(hmask)                                       # (ks, hw)

    kernel = functools.partial(_fused_conv_kernel, ks=ks, pad=pad, width=w,
                               hw=hw, nb=nb, cin=cin, kpad=kpad, l0=l0)

    cost = pl.CostEstimate(
        flops=2 * n * cout * cin * ks * ks * hw,
        transcendentals=0,
        bytes_accessed=(x_flat.size * x_flat.dtype.itemsize
                        + w_panel.size * w_panel.dtype.itemsize
                        + n * cout * hw * jnp.dtype(out_dtype).itemsize))

    out = pl.pallas_call(
        kernel,
        out_shape=jax.ShapeDtypeStruct((n, cout, hw), out_dtype),
        grid=(n // nb,),
        in_specs=[
            pl.BlockSpec((nb, cin, hw), lambda i: (i, 0, 0)),
            pl.BlockSpec((cout, kdim), lambda i: (0, 0)),
            pl.BlockSpec((cout, 1), lambda i: (0, 0)),
            pl.BlockSpec((ks, hw), lambda i: (0, 0)),
        ],
        out_specs=pl.BlockSpec((nb, cout, hw), lambda i: (i, 0, 0)),
        scratch_shapes=[
            pltpu.VMEM((nb, cin, p_len), jnp.float32),   # zero-haloed staging
            pltpu.VMEM((kdim, nb * hw), jnp.float32),    # fused-im2col slab
        ],
        compiler_params=pltpu.CompilerParams(
            dimension_semantics=("parallel",)),
        cost_estimate=cost,
    )(x_flat, w_panel, b2, hmask)

    # (N, Cout, H*W) -> (N, Cout, H, W): free reshape, already NCHW-ordered.
    return out.reshape(n, cout, h, w)


# ---------------------------------------------------------------------------
# Zero-group stats: one jitted reduction, single device->host transfer
# ---------------------------------------------------------------------------

@jax.jit
def _zero_group_stats(w, threshold):
    abs_max = jnp.max(jnp.abs(w), axis=1)
    zeros = jnp.sum((abs_max == 0).astype(jnp.int32))
    near = jnp.sum((abs_max < threshold).astype(jnp.int32))
    return jnp.stack([zeros, near])


# ---------------------------------------------------------------------------
# Wrapper (mirrors HierarchicalGroupWrapper around a Conv2d)
# ---------------------------------------------------------------------------

class HierarchicalGroupWrapperPallas:
    def __init__(self, cin, cout, ksize, pad, groups, key,
                 compute_dtype=jnp.bfloat16, out_dtype=None):
        self.cin, self.cout, self.ksize, self.pad = cin, cout, ksize, pad
        self._param_groups = groups
        self.compute_dtype = compute_dtype
        self.out_dtype = compute_dtype if out_dtype is None else out_dtype
        kw_key, kb_key = jax.random.split(key)
        fan_in = cin * ksize * ksize
        bound = 1.0 / (fan_in ** 0.5)
        # PyTorch layout: [Cout, Cin, Kh, Kw]
        self.weight = jax.random.uniform(
            kw_key, (cout, cin, ksize, ksize), jnp.float32, -bound, bound)
        self.bias = jax.random.uniform(
            kb_key, (cout,), jnp.float32, -bound, bound)

    # ---- HierarchicalGroup metadata (pure Python bookkeeping) -------------
    def get_param_groups(self):
        return {'module': self, 'group': self._param_groups, 'name': ''}

    # ---- get_weights(): one row per base-level (output-channel) group -----
    def get_weights(self):
        return self.weight.reshape(self.cout, -1)            # [Cout, Cin*Kh*Kw]

    # ---- count_zero_groups(): single jitted reduction, one host sync ------
    def count_zero_groups(self, threshold=1e-5):
        w = self.get_weights()
        zeros, near_zeros = (int(v) for v in
                             jax.device_get(_zero_group_stats(w, threshold)))
        return {'total': int(w.shape[0]), 'zeros': zeros,
                'near_zeros': near_zeros}

    # ---- forward(): fused Pallas conv -------------------------------------
    def forward(self, x_nchw):
        assert x_nchw.shape[1] == self.cin
        return _conv2d_same_forward(x_nchw, self.weight, self.bias,
                                    pad=self.pad,
                                    compute_dtype=self.compute_dtype,
                                    out_dtype=self.out_dtype)

    __call__ = forward


# ---------------------------------------------------------------------------
# Reference conv (pure JAX) for correctness checks
# ---------------------------------------------------------------------------

def _ref_conv_nchw(x, weight, bias, pad):
    out = jax.lax.conv_general_dilated(
        x, weight, window_strides=(1, 1), padding=[(pad, pad), (pad, pad)],
        dimension_numbers=('NCHW', 'OIHW', 'NCHW'))
    return out + bias.reshape(1, -1, 1, 1)


if __name__ == "__main__":
    key = jax.random.PRNGKey(0)
    k_x, k_p = jax.random.split(key)

    # Shapes consistent with the wrapped Conv2d(4 -> 8, 3x3, pad=1).
    N, Cin, H, W = 2, 4, 16, 16
    Cout, K, PAD = 8, 3, 1

    x = jax.random.normal(k_x, (N, Cin, H, W), jnp.float32)

    # bf16 compute + bf16 output (recommended default) — loose tolerance.
    wrapper_bf16 = HierarchicalGroupWrapperPallas(
        Cin, Cout, K, PAD, groups=["conv", "layer0"], key=k_p,
        compute_dtype=jnp.bfloat16)
    y_bf16 = jax.block_until_ready(wrapper_bf16(x))

    # f32 compute + f32 output — strict validation instance only.
    wrapper_f32 = HierarchicalGroupWrapperPallas(
        Cin, Cout, K, PAD, groups=["conv", "layer0"], key=k_p,
        compute_dtype=jnp.float32)
    y_f32 = jax.block_until_ready(wrapper_f32(x))

    y_ref = _ref_conv_nchw(x, wrapper_f32.weight, wrapper_f32.bias, PAD)
    assert y_f32.shape == (N, Cout, H, W)
    assert y_bf16.shape == (N, Cout, H, W)
    assert y_bf16.dtype == jnp.bfloat16
    assert jnp.allclose(y_f32, y_ref, atol=1e-4, rtol=1e-4), "f32 conv mismatch"
    assert jnp.allclose(y_bf16.astype(jnp.float32), y_ref,
                        atol=5e-2, rtol=5e-2), "bf16 conv mismatch"

    # Exercise the group bookkeeping path.
    stats = wrapper_f32.count_zero_groups()
    assert stats['total'] == Cout
    assert stats['zeros'] == 0

    print("KERNEL_OK")
</pallas_src>

<mosaic_0001>
module attributes {stable_mosaic.version = 11 : i64} {
  func.func @_fused_conv_kernel(%arg0: i32, %arg1: memref<1x4x256xf32, #tpu.memory_space<vmem>>, %arg2: memref<8x72xbf16, #tpu.memory_space<vmem>>, %arg3: memref<8x1xf32, #tpu.memory_space<vmem>>, %arg4: memref<3x256xf32, #tpu.memory_space<vmem>>, %arg5: memref<1x8x256xbf16, #tpu.memory_space<vmem>>, %arg6: memref<1x4x401xf32, #tpu.memory_space<vmem>>, %arg7: memref<72x256xf32, #tpu.memory_space<vmem>>) attributes {dimension_semantics = [#tpu.dimension_semantics<parallel>], iteration_bounds = array<i64: 2>, scalar_prefetch = 0 : i64, scratch_operands = 2 : i64, tpu.core_type = #tpu.core_type<tc>, window_params = [{transform_indices = @transform_0, window_bounds = array<i64: 1, 4, 256>}, {pipeline_mode = #tpu.pipeline_mode<synchronous>, transform_indices = @transform_1, window_bounds = array<i64: 8, 72>}, {pipeline_mode = #tpu.pipeline_mode<synchronous>, transform_indices = @transform_2, window_bounds = array<i64: 8, 1>}, {pipeline_mode = #tpu.pipeline_mode<synchronous>, transform_indices = @transform_3, window_bounds = array<i64: 3, 256>}, {transform_indices = @transform_4, window_bounds = array<i64: 1, 8, 256>}]} {
    %cst = arith.constant 0.000000e+00 : f32
    %0 = vector.broadcast %cst : f32 to vector<1x4x401xf32>
    %c0 = arith.constant 0 : index
    %c0_0 = arith.constant 0 : index
    %c0_1 = arith.constant 0 : index
    %1 = vector.load %arg6[%c0, %c0_0, %c0_1] : memref<1x4x401xf32, #tpu.memory_space<vmem>>, vector<1x4x401xf32>
    tpu.vector_store %arg6[%c0, %c0_0, %c0_1], %0 {strides = array<i32>} : memref<1x4x401xf32, #tpu.memory_space<vmem>>, vector<1x4x401xf32>,
    %cst_2 = arith.constant 0.000000e+00 : f32
    %2 = vector.broadcast %cst_2 : f32 to vector<72x256xf32>
    %c0_3 = arith.constant 0 : index
    %c0_4 = arith.constant 0 : index
    %3 = vector.load %arg7[%c0_3, %c0_4] : memref<72x256xf32, #tpu.memory_space<vmem>>, vector<72x256xf32>
    tpu.vector_store %arg7[%c0_3, %c0_4], %2 {strides = array<i32>} : memref<72x256xf32, #tpu.memory_space<vmem>>, vector<72x256xf32>,
    %c0_5 = arith.constant 0 : index
    %c0_6 = arith.constant 0 : index
    %c0_7 = arith.constant 0 : index
    %4 = vector.load %arg1[%c0_5, %c0_6, %c0_7] : memref<1x4x256xf32, #tpu.memory_space<vmem>>, vector<1x4x256xf32>
    %5 = vector.shape_cast %4 : vector<1x4x256xf32> to vector<4x256xf32>
    %c0_8 = arith.constant 0 : index
    %c0_9 = arith.constant 0 : index
    %c128 = arith.constant 128 : index
    %6 = vector.load %arg6[%c0_8, %c0_9, %c128] : memref<1x4x401xf32, #tpu.memory_space<vmem>>, vector<1x4x256xf32>
    %7 = vector.shape_cast %6 : vector<1x4x256xf32> to vector<4x256xf32>
    %8 = vector.shape_cast %5 : vector<4x256xf32> to vector<1x4x256xf32>
    tpu.vector_store %arg6[%c0_8, %c0_9, %c128], %8 {strides = array<i32>} : memref<1x4x401xf32, #tpu.memory_space<vmem>>, vector<1x4x256xf32>,
    %c0_10 = arith.constant 0 : index
    %c0_11 = arith.constant 0 : index
    %c111 = arith.constant 111 : index
    %9 = vector.load %arg6[%c0_10, %c0_11, %c111] : memref<1x4x401xf32, #tpu.memory_space<vmem>>, vector<1x4x256xf32>
    %10 = vector.shape_cast %9 : vector<1x4x256xf32> to vector<4x256xf32>
    %c0_12 = arith.constant 0 : index
    %c0_13 = arith.constant 0 : index
    %11 = vector.load %arg4[%c0_12, %c0_13] : memref<3x256xf32, #tpu.memory_space<vmem>>, vector<1x256xf32>
    %12 = vector.broadcast %11 : vector<1x256xf32> to vector<4x256xf32>
    %13 = arith.mulf %10, %12 : vector<4x256xf32>
    %c0_14 = arith.constant 0 : index
    %c0_15 = arith.constant 0 : index
    %14 = vector.load %arg7[%c0_14, %c0_15] : memref<72x256xf32, #tpu.memory_space<vmem>>, vector<4x256xf32>
    tpu.vector_store %arg7[%c0_14, %c0_15], %13 {strides = array<i32>} : memref<72x256xf32, #tpu.memory_space<vmem>>, vector<4x256xf32>,
    %c0_16 = arith.constant 0 : index
    %c0_17 = arith.constant 0 : index
    %c112 = arith.constant 112 : index
    %15 = vector.load %arg6[%c0_16, %c0_17, %c112] : memref<1x4x401xf32, #tpu.memory_space<vmem>>, vector<1x4x256xf32>
    %16 = vector.shape_cast %15 : vector<1x4x256xf32> to vector<4x256xf32>
    %c8 = arith.constant 8 : index
    %c0_18 = arith.constant 0 : index
    %17 = vector.load %arg7[%c8, %c0_18] : memref<72x256xf32, #tpu.memory_space<vmem>>, vector<4x256xf32>
    tpu.vector_store %arg7[%c8, %c0_18], %16 {strides = array<i32>} : memref<72x256xf32, #tpu.memory_space<vmem>>, vector<4x256xf32>,
    %c0_19 = arith.constant 0 : index
    %c0_20 = arith.constant 0 : index
    %c113 = arith.constant 113 : index
    %18 = vector.load %arg6[%c0_19, %c0_20, %c113] : memref<1x4x401xf32, #tpu.memory_space<vmem>>, vector<1x4x256xf32>
    %19 = vector.shape_cast %18 : vector<1x4x256xf32> to vector<4x256xf32>
    %c2 = arith.constant 2 : index
    %c0_21 = arith.constant 0 : index
    %20 = vector.load %arg4[%c2, %c0_21] : memref<3x256xf32, #tpu.memory_space<vmem>>, vector<1x256xf32>
    %21 = vector.broadcast %20 : vector<1x256xf32> to vector<4x256xf32>
    %22 = arith.mulf %19, %21 : vector<4x256xf32>
    %c16 = arith.constant 16 : index
    %c0_22 = arith.constant 0 : index
    %23 = vector.load %arg7[%c16, %c0_22] : memref<72x256xf32, #tpu.memory_space<vmem>>, vector<4x256xf32>
    tpu.vector_store %arg7[%c16, %c0_22], %22 {strides = array<i32>} : memref<72x256xf32, #tpu.memory_space<vmem>>, vector<4x256xf32>,
    %c0_23 = arith.constant 0 : index
    %c0_24 = arith.constant 0 : index
    %c127 = arith.constant 127 : index
    %24 = vector.load %arg6[%c0_23, %c0_24, %c127] : memref<1x4x401xf32, #tpu.memory_space<vmem>>, vector<1x4x256xf32>
    %25 = vector.shape_cast %24 : vector<1x4x256xf32> to vector<4x256xf32>
    %c0_25 = arith.constant 0 : index
    %c0_26 = arith.constant 0 : index
    %26 = vector.load %arg4[%c0_25, %c0_26] : memref<3x256xf32, #tpu.memory_space<vmem>>, vector<1x256xf32>
    %27 = vector.broadcast %26 : vector<1x256xf32> to vector<4x256xf32>
    %28 = arith.mulf %25, %27 : vector<4x256xf32>
    %c24 = arith.constant 24 : index
    %c0_27 = arith.constant 0 : index
    %29 = vector.load %arg7[%c24, %c0_27] : memref<72x256xf32, #tpu.memory_space<vmem>>, vector<4x256xf32>
    tpu.vector_store %arg7[%c24, %c0_27], %28 {strides = array<i32>} : memref<72x256xf32, #tpu.memory_space<vmem>>, vector<4x256xf32>,
    %c0_28 = arith.constant 0 : index
    %c0_29 = arith.constant 0 : index
    %c128_30 = arith.constant 128 : index
    %30 = vector.load %arg6[%c0_28, %c0_29, %c128_30] : memref<1x4x401xf32, #tpu.memory_space<vmem>>, vector<1x4x256xf32>
    %31 = vector.shape_cast %30 : vector<1x4x256xf32> to vector<4x256xf32>
    %c32 = arith.constant 32 : index
    %c0_31 = arith.constant 0 : index
    %32 = vector.load %arg7[%c32, %c0_31] : memref<72x256xf32, #tpu.memory_space<vmem>>, vector<4x256xf32>
    tpu.vector_store %arg7[%c32, %c0_31], %31 {strides = array<i32>} : memref<72x256xf32, #tpu.memory_space<vmem>>, vector<4x256xf32>,
    %c0_32 = arith.constant 0 : index
    %c0_33 = arith.constant 0 : index
    %c129 = arith.constant 129 : index
    %33 = vector.load %arg6[%c0_32, %c0_33, %c129] : memref<1x4x401xf32, #tpu.memory_space<vmem>>, vector<1x4x256xf32>
    %34 = vector.shape_cast %33 : vector<1x4x256xf32> to vector<4x256xf32>
    %c2_34 = arith.constant 2 : index
    %c0_35 = arith.constant 0 : index
    %35 = vector.load %arg4[%c2_34, %c0_35] : memref<3x256xf32, #tpu.memory_space<vmem>>, vector<1x256xf32>
    %36 = vector.broadcast %35 : vector<1x256xf32> to vector<4x256xf32>
    %37 = arith.mulf %34, %36 : vector<4x256xf32>
    %c40 = arith.constant 40 : index
    %c0_36 = arith.constant 0 : index
    %38 = vector.load %arg7[%c40, %c0_36] : memref<72x256xf32, #tpu.memory_space<vmem>>, vector<4x256xf32>
    tpu.vector_store %arg7[%c40, %c0_36], %37 {strides = array<i32>} : memref<72x256xf32, #tpu.memory_space<vmem>>, vector<4x256xf32>,
    %c0_37 = arith.constant 0 : index
    %c0_38 = arith.constant 0 : index
    %c143 = arith.constant 143 : index
    %39 = vector.load %arg6[%c0_37, %c0_38, %c143] : memref<1x4x401xf32, #tpu.memory_space<vmem>>, vector<1x4x256xf32>
    %40 = vector.shape_cast %39 : vector<1x4x256xf32> to vector<4x256xf32>
    %c0_39 = arith.constant 0 : index
    %c0_40 = arith.constant 0 : index
    %41 = vector.load %arg4[%c0_39, %c0_40] : memref<3x256xf32, #tpu.memory_space<vmem>>, vector<1x256xf32>
    %42 = vector.broadcast %41 : vector<1x256xf32> to vector<4x256xf32>
    %43 = arith.mulf %40, %42 : vector<4x256xf32>
    %c48 = arith.constant 48 : index
    %c0_41 = arith.constant 0 : index
    %44 = vector.load %arg7[%c48, %c0_41] : memref<72x256xf32, #tpu.memory_space<vmem>>, vector<4x256xf32>
    tpu.vector_store %arg7[%c48, %c0_41], %43 {strides = array<i32>} : memref<72x256xf32, #tpu.memory_space<vmem>>, vector<4x256xf32>,
    %c0_42 = arith.constant 0 : index
    %c0_43 = arith.constant 0 : index
    %c144 = arith.constant 144 : index
    %45 = vector.load %arg6[%c0_42, %c0_43, %c144] : memref<1x4x401xf32, #tpu.memory_space<vmem>>, vector<1x4x256xf32>
    %46 = vector.shape_cast %45 : vector<1x4x256xf32> to vector<4x256xf32>
    %c56 = arith.constant 56 : index
    %c0_44 = arith.constant 0 : index
    %47 = vector.load %arg7[%c56, %c0_44] : memref<72x256xf32, #tpu.memory_space<vmem>>, vector<4x256xf32>
    tpu.vector_store %arg7[%c56, %c0_44], %46 {strides = array<i32>} : memref<72x256xf32, #tpu.memory_space<vmem>>, vector<4x256xf32>,
    %c0_45 = arith.constant 0 : index
    %c0_46 = arith.constant 0 : index
    %c145 = arith.constant 145 : index
    %48 = vector.load %arg6[%c0_45, %c0_46, %c145] : memref<1x4x401xf32, #tpu.memory_space<vmem>>, vector<1x4x256xf32>
    %49 = vector.shape_cast %48 : vector<1x4x256xf32> to vector<4x256xf32>
    %c2_47 = arith.constant 2 : index
    %c0_48 = arith.constant 0 : index
    %50 = vector.load %arg4[%c2_47, %c0_48] : memref<3x256xf32, #tpu.memory_space<vmem>>, vector<1x256xf32>
    %51 = vector.broadcast %50 : vector<1x256xf32> to vector<4x256xf32>
    %52 = arith.mulf %49, %51 : vector<4x256xf32>
    %c64 = arith.constant 64 : index
    %c0_49 = arith.constant 0 : index
    %53 = vector.load %arg7[%c64, %c0_49] : memref<72x256xf32, #tpu.memory_space<vmem>>, vector<4x256xf32>
    tpu.vector_store %arg7[%c64, %c0_49], %52 {strides = array<i32>} : memref<72x256xf32, #tpu.memory_space<vmem>>, vector<4x256xf32>,
    %c0_50 = arith.constant 0 : index
    %c0_51 = arith.constant 0 : index
    %54 = vector.load %arg7[%c0_50, %c0_51] : memref<72x256xf32, #tpu.memory_space<vmem>>, vector<72x256xf32>
    %55 = arith.truncf %54 : vector<72x256xf32> to vector<72x256xbf16>
    %c0_52 = arith.constant 0 : index
    %c0_53 = arith.constant 0 : index
    %56 = vector.load %arg2[%c0_52, %c0_53] : memref<8x72xbf16, #tpu.memory_space<vmem>>, vector<8x72xbf16>
    %cst_54 = arith.constant dense<0.000000e+00> : vector<8x256xf32>
    %57 = tpu.matmul %56, %55, %cst_54 {dimension_numbers = #tpu.dot_dimension_numbers<[1], [0], [0], [1], [0, 0, 1, 1], [], []>} : vector<8x72xbf16>, vector<72x256xbf16>, vector<8x256xf32> -> vector<8x256xf32>
    %c0_55 = arith.constant 0 : index
    %c0_56 = arith.constant 0 : index
    %58 = vector.load %arg3[%c0_55, %c0_56] : memref<8x1xf32, #tpu.memory_space<vmem>>, vector<8x1xf32>
    %59 = vector.broadcast %58 : vector<8x1xf32> to vector<8x256xf32>
    %60 = arith.addf %57, %59 : vector<8x256xf32>
    %61 = arith.truncf %60 : vector<8x256xf32> to vector<8x256xbf16>
    %c0_57 = arith.constant 0 : index
    %c0_58 = arith.constant 0 : index
    %c0_59 = arith.constant 0 : index
    %62 = vector.load %arg5[%c0_57, %c0_58, %c0_59] : memref<1x8x256xbf16, #tpu.memory_space<vmem>>, vector<1x8x256xbf16>
    %63 = vector.shape_cast %62 : vector<1x8x256xbf16> to vector<8x256xbf16>
    %64 = vector.shape_cast %61 : vector<8x256xbf16> to vector<1x8x256xbf16>
    tpu.vector_store %arg5[%c0_57, %c0_58, %c0_59], %64 {strides = array<i32>} : memref<1x8x256xbf16, #tpu.memory_space<vmem>>, vector<1x8x256xbf16>,
    return
  }
  func.func @transform_0(%arg0: i32) -> (i32, i32, i32) {
    %c0_i32 = arith.constant 0 : i32
    %c0_i32_0 = arith.constant 0 : i32
    %c0_i32_1 = arith.constant 0 : i32
    return %arg0, %c0_i32, %c0_i32_0 : i32, i32, i32
  }
  func.func @transform_1(%arg0: i32) -> (i32, i32) {
    %c0_i32 = arith.constant 0 : i32
    %c0_i32_0 = arith.constant 0 : i32
    %c0_i32_1 = arith.constant 0 : i32
    return %c0_i32, %c0_i32_0 : i32, i32
  }
  func.func @transform_2(%arg0: i32) -> (i32, i32) {
    %c0_i32 = arith.constant 0 : i32
    %c0_i32_0 = arith.constant 0 : i32
    %c0_i32_1 = arith.constant 0 : i32
    return %c0_i32, %c0_i32_0 : i32, i32
  }
  func.func @transform_3(%arg0: i32) -> (i32, i32) {
    %c0_i32 = arith.constant 0 : i32
    %c0_i32_0 = arith.constant 0 : i32
    %c0_i32_1 = arith.constant 0 : i32
    return %c0_i32, %c0_i32_0 : i32, i32
  }
  func.func @transform_4(%arg0: i32) -> (i32, i32, i32) {
    %c0_i32 = arith.constant 0 : i32
    %c0_i32_0 = arith.constant 0 : i32
    %c0_i32_1 = arith.constant 0 : i32
    return %arg0, %c0_i32, %c0_i32_0 : i32, i32, i32
  }
}

</mosaic_0001>

<bundles_post_ra>
// kernel: _conv2d_same_forward.1
= control target key start
LH: loop header
LB: loop body
LE: loop exit
PB: predicated region body
PF: predicated region fallthrough
CT: control target
= control target key end

     0   :  { %s710_s15 = smov 0   ;;  %s839_s0 = inlined_call_operand.vmem [shape: f32[2,4,256], index: 0, kind: input, shape index: {}]   ;;  %s840_s1 = inlined_call_operand.vmem [shape: bf16[8,72], index: 1, kind: input, shape index: {}]   ;;  %s841_s2 = inlined_call_operand.vmem [shape: f32[8,1], index: 2, kind: input, shape index: {}]   ;;  %s842_s3 = inlined_call_operand.vmem [shape: f32[3,256], index: 3, kind: input, shape index: {}]   ;;  %s843_s4 = inlined_call_operand.vmem [shape: bf16[2,8,256], index: 4, kind: output, shape index: {}]  }
   0x1 LB: > { %s630_s16 = sadd.s32 4294967295, %s673_s15   ;;  %p634_p0 = scmp.ge.s32.totalorder %s673_s15, 1  ;;  %s673_s15 = sphi %s710_s15, %s14_s15  }
   0x2   : > { %p162_p1 = scmp.lt.s32.totalorder %s673_s15, 3 }
   0x4   : > { %p163_p2 = pnand %p634_p0, %p162_p1 }
   0x5   : > { %s675_s27 = smov (!%p163_p2), 111   ;;  %s676_s30 = smov (!%p163_p2), 127  }
   0x6   : > { %166 = sbr.rel (%p163_p2) target bundleno = 499 (0x1f3), region = 36  ;;  %s677_s5 = smov (!%p163_p2), 15  }
   0x7   : > { %s678_s6 = smov (!%p163_p2), 113   ;;  %s679_s7 = smov (!%p163_p2), 1  }
   0x8   : > { %s680_s8 = smov (!%p163_p2), 17   ;;  %p188_p3 = scmp.lt.s32.totalorder (!%p163_p2), %s630_s16, 1 }
   0x9   : > { %s682_s13 = smov (!%p163_p2), 112   ;;  %s683_s14 = smov (!%p163_p2), 16  }
   0xb   : > { %v226_v0 = vld [vmem:[%s842_s3] ss:$4 sm:$0x3]  ;;  %v639_v3 = vld [vmem:[%s842_s3 + $0x2] ss:$4 sm:$0x3] }
   0xc   : > { %v228_v1 = vperm.slane %v226_v0, 0  ;;  %v229_v2 = vperm.slane %v226_v0, 1  ;;  %vm200_vm0 = vcmask 1043456   ;;  %v326_v4 = vld [vmem:[%s842_s3] ss:$4 sm:$0x3] }
   0xd   : > { %v291_v6 = vperm.slane %v639_v3, 1  ;;  %v328_v7 = vperm.slane %v326_v4, 0  ;;  %v329_v8 = vperm.slane %v326_v4, 1  ;;  %v640_v9 = vld [vmem:[%s842_s3 + $0x2] ss:$4 sm:$0x3] }
   0xe   : > { %v230_v5 = vrot.slane %v229_v2, 4  ;;  %v376_v12 = vperm.slane %v640_v9, 1  ;;  %v409_v13 = vld [vmem:[%s842_s3] ss:$4 sm:$0x3]  ;;  %v290_v17 = vperm.slane %v639_v3, 0 }
   0xf   : > { %v330_v11 = vrot.slane %v329_v8, 4  ;;  %v411_v14 = vperm.slane %v409_v13, 0  ;;  %v412_v15 = vperm.slane %v409_v13, 1  ;;  %v641_v16 = vld [vmem:[%s842_s3 + $0x2] ss:$4 sm:$0x3] }
  0x10   : > { %v231_v10 = vsel %vm200_vm0, %v228_v1, %v230_v5  ;;  %v292_v18 = vrot.slane %v291_v6, 4  ;;  %v471_v21 = vperm.slane %v641_v16, 1  ;;  %v375_v22 = vperm.slane %v640_v9, 0  ;;  %s845_s16 = smov (!%p188_p3, %s630_s16), 1 }
  0x11   : > { %232 = vrot.lane.b32.xlu0 %v231_v10, %s675_s27  ;;  %v331_v19 = vsel %vm200_vm0, %v328_v7, %v330_v11  ;;  %v413_v20 = vrot.slane %v412_v15, 4  ;;  %v377_v23 = vrot.slane %v376_v12, 4  ;;  %v470_v26 = vperm.slane %v641_v16, 0  ;;  %s646_s9 = sshll.u32 %s845_s16, 3 }
  0x12   : > { %332 = vrot.lane.b32.xlu1 %v331_v19, %s676_s30  ;;  %v293_v25 = vsel %vm200_vm0, %v290_v17, %v292_v18  ;;  %v472_v27 = vrot.slane %v471_v21, 4  ;;  %vm201_vm1 = vcmask 138244   ;;  %s192_s12 = scalar_lea.vmem %s839_s0, %s646_s9  ;;  %v681_v30 = vmov 0.0   ;;  %s197_s23 = scalar_lea.vmem %s843_s4, %s646_s9 }
  0x13   : > { %v414_v24 = vsel %vm200_vm0, %v411_v14, %v413_v20  ;;  %v378_v28 = vsel %vm200_vm0, %v375_v22, %v377_v23  ;;  %vm202_vm2 = vmor %vm201_vm1, %vm200_vm0  ;;  %199 = vst [vmem:[#allocation2] sm:$0xff] %v681_v30  ;;  %v761_v31 = vld [vmem:[%s192_s12] sm:$0xff]  ;;  %vm235_vm3 = vcmask 908288   ;;  %vm297_vm4 = vcmask 924672  }
  0x14   : > { %415 = vrot.lane.b32.xlu2 %v414_v24, %s677_s5  ;;  %v473_v29 = vsel %vm200_vm0, %v470_v26, %v472_v27  ;;  %203 = vst.msk [vmem:[#allocation2 + $0x8] sm:$0xff] %vm202_vm2, %v681_v30  ;;  %vm335_vm5 = vcmask 1039360   ;;  %vm355_vm6 = vcmask 7168   ;;  %vm317_vm7 = vcmask 121856  }
  0x15   : > { %223 = vst [vmem:[#allocation2 + $0x4] sm:$0xff] %v761_v31  ;;  %vm255_vm8 = vcmask 138240   ;;  %vm459_vm9 = vcmask 916480   ;;  %vm278_vm10 = vcmask 130048   ;;  %vm537_vm11 = vcmask 588800  }
  0x16   : > { %204 = vst [vmem:[#allocation3] sm:$0xff] %v681_v30 }
  0x17   : > { %205 = vst [vmem:[#allocation3 + $0x38] sm:$0xff] %v681_v30 }
  0x18   : > { %206 = vst [vmem:[#allocation3 + $0x78] sm:$0xff] %v681_v30 }
  0x19   : > { %294 = vrot.lane.b32.xlu0 %v293_v25, %s678_s6  ;;  %207 = vst [vmem:[#allocation3 + $0x58] sm:$0xff] %v681_v30 }
  0x1a   : > { %379 = vrot.lane.b32.xlu1 %v378_v28, %s679_s7  ;;  %208 = vst [vmem:[#allocation3 + $0x20] sm:$0xff] %v681_v30 }
  0x1b   : > { %209 = vst [vmem:[#allocation3 + $0x8] sm:$0xff] %v681_v30  ;;  %v372_v63 = vld [vmem:[#allocation2 + $0xc] sm:$0xf] }
  0x1c   : > { %474 = vrot.lane.b32.xlu2 %v473_v29, %s680_s8  ;;  %210 = vst [vmem:[#allocation3 + $0x70] sm:$0xff] %v681_v30  ;;  %v225_v33 = vld [vmem:[#allocation2 + $0x8] sm:$0xf]  ;;  %v224_v34 = vld [vmem:[#allocation2] sm:$0xff]  ;;  %v408_v6 = vld [vmem:[#allocation2 + $0xc] sm:$0xf] }
  0x1d   : > { %211 = vst [vmem:[#allocation3 + $0x80] sm:$0xff] %v681_v30  ;;  %v263_v41 = vld [vmem:[#allocation2 + $0x8] sm:$0xf]  ;;  %v444_v15 = vld [vmem:[#allocation2 + $0xc] sm:$0xf] }
  0x1e   : > { %212 = vst [vmem:[#allocation3 + $0x88] sm:$0xff] %v681_v30  ;;  %v286_v45 = vld [vmem:[#allocation2 + $0x8] sm:$0xf]  ;;  %v467_v21 = vld [vmem:[#allocation2 + $0xc] sm:$0xf] }
  0x1f   : > { %213 = vst [vmem:[#allocation3 + $0x40] sm:$0xff] %v681_v30  ;;  %v325_v54 = vld [vmem:[#allocation2 + $0x8] sm:$0xf] }
  0x20   : > { %214 = vst [vmem:[#allocation3 + $0x50] sm:$0xff] %v681_v30 }
  0x21   : > { %215 = vst [vmem:[#allocation3 + $0x28] sm:$0xff] %v681_v30 }
  0x22   : > { %216 = vst [vmem:[#allocation3 + $0x10] sm:$0xff] %v681_v30 }
  0x23   : > { %217 = vst [vmem:[#allocation3 + $0x48] sm:$0xff] %v681_v30 }
  0x24   : > { %218 = vst [vmem:[#allocation3 + $0x30] sm:$0xff] %v681_v30 }
  0x25   : > { %219 = vst [vmem:[#allocation3 + $0x18] sm:$0xff] %v681_v30 }
  0x26   : > { %220 = vst [vmem:[#allocation3 + $0x68] sm:$0xff] %v681_v30 }
  0x27   : > { %221 = vst [vmem:[#allocation3 + $0x60] sm:$0xff] %v681_v30 }
  0x6e   : > { %v416_v4 = vpop.permute.xlu2 %415 }
  0x6f   : > { %v417_v5 = vrot.slane %v416_v4, 4 }
  0x71   : > { %v422_v10 = vmul.f32 %v417_v5, %v408_v6  ;;  %v418_v13 = vsel %vm317_vm7, %v417_v5, %v416_v4 }
  0x72   : > { %v421_v14 = vmul.f32 %v418_v13, %v761_v31 }
  0x76   : > { %v475_v16 = vpop.permute.xlu2 %474 }
  0x77   : > { %v476_v20 = vrot.slane %v475_v16, 4 }
  0x79   : > { %v481_v22 = vmul.f32 %v476_v20, %v467_v21  ;;  %v477_v26 = vsel %vm255_vm8, %v476_v20, %v475_v16 }
  0x7a   : > { %v480_v27 = vmul.f32 %v477_v26, %v761_v31 }
  0x83   : > { %v233_v32 = vpop.permute.xlu0 %232 }
  0x84   : > { %v234_v35 = vrot.slane %v233_v32, 4  ;;  %v333_v47 = vpop.permute.xlu1 %332 }
  0x85   : > { %v334_v50 = vrot.slane %v333_v47, 4 }
  0x86   : > { %v236_v36 = vsel %vm235_vm3, %v234_v35, %v233_v32  ;;  %v240_v37 = vmul.f32 %v234_v35, %v225_v33 }
  0x87   : > { %v239_v38 = vmul.f32 %v236_v36, %v224_v34  ;;  %v336_v55 = vsel %vm335_vm5, %v334_v50, %v333_v47  ;;  %v340_v56 = vmul.f32 %v334_v50, %v325_v54 }
  0x88   : > { %245 = vst [vmem:[#allocation1 + $0x10] ss:$2 sm:$0xff] %v240_v37  ;;  %v339_v57 = vmul.f32 %v336_v55, %v224_v34 }
  0x89   : > { %243 = vst [vmem:[#allocation1] ss:$2 sm:$0xff] %v239_v38 }
  0x8b   : > { %v295_v39 = vpop.permute.xlu0 %294 }
  0x8c   : > { %v296_v42 = vrot.slane %v295_v39, 4  ;;  %v380_v58 = vpop.permute.xlu1 %379 }
  0x8d   : > { %v381_v62 = vrot.slane %v380_v58, 4 }
  0x8e   : > { %v298_v46 = vsel %vm297_vm4, %v296_v42, %v295_v39  ;;  %v302_v48 = vmul.f32 %v296_v42, %v286_v45 }
  0x8f   : > { %v765_v40 = vld.sshfl [vmem:[#allocation1 + $0x10] sm:$0xff pattern:$0x75316420]  ;;  %v301_v49 = vmul.f32 %v298_v46, %v224_v34  ;;  %v386_v0 = vmul.f32 %v381_v62, %v372_v63  ;;  %v382_v7 = vsel %vm355_vm6, %v381_v62, %v380_v58 }
  0x90   : > { %v767_v43 = vld.sshfl [vmem:[#allocation1] sm:$0xff pattern:$0x75316420]  ;;  %v769_v44 = vld.sshfl [vmem:[#allocation1 + $0x8] sm:$0xff pattern:$0x75316420]  ;;  %v385_v11 = vmul.f32 %v382_v7, %v761_v31 }
  0x91   : > { %266 = vst [vmem:[#allocation1] ss:$2 sm:$0xff] %v224_v34 }
  0x92   : > { %268 = vst [vmem:[#allocation1 + $0x10] ss:$2 sm:$0xff] %v263_v41 }
  0x98   : > { %v772_v51 = vld.sshfl [vmem:[#allocation1] sm:$0xff pattern:$0x75316420]  ;;  %v774_v52 = vld.sshfl [vmem:[#allocation1 + $0x8] sm:$0xff pattern:$0x75316420] }
  0x99   : > { %v776_v53 = vld.sshfl [vmem:[#allocation1 + $0x10] sm:$0xff pattern:$0x75316420]  ;;  %305 = vst [vmem:[#allocation1] ss:$2 sm:$0xff] %v301_v49 }
  0x9a   : > { %307 = vst [vmem:[#allocation1 + $0x10] ss:$2 sm:$0xff] %v302_v48 }
  0xa0   : > { %v309_v59 = vld.sshfl [vmem:[#allocation1 + $0x8] sm:$0xff pattern:$0x75316420]  ;;  %v308_v60 = vld.sshfl [vmem:[#allocation1] sm:$0xff pattern:$0x75316420] }
  0xa1   : > { %v310_v61 = vld.sshfl [vmem:[#allocation1 + $0x10] sm:$0xff pattern:$0x75316420]  ;;  %313 = vrot.lane.b32.xlu1 %v309_v59, %s677_s5  ;;  %311 = vrot.lane.b32.xlu0 %v308_v60, %s677_s5  ;;  %343 = vst [vmem:[#allocation1] ss:$2 sm:$0xff] %v339_v57 }
  0xa2   : > { %315 = vrot.lane.b32.xlu2 %v310_v61, %s677_s5  ;;  %345 = vst [vmem:[#allocation1 + $0x10] ss:$2 sm:$0xff] %v340_v56  ;;  %v531_v61 = vld [vmem:[%s841_s2] sm:$0xff] }
  0xa8   : > { %v346_v1 = vld.sshfl [vmem:[#allocation1] sm:$0xff pattern:$0x75316420]  ;;  %v347_v2 = vld.sshfl [vmem:[#allocation1 + $0x8] sm:$0xff pattern:$0x75316420] }
  0xa9   : > { %364 = vst [vmem:[#allocation1] ss:$2 sm:$0xff] %v761_v31  ;;  %v348_v3 = vld.sshfl [vmem:[#allocation1 + $0x10] sm:$0xff pattern:$0x75316420] }
  0xaa   : > { %391 = vst [vmem:[#allocation1 + $0x10] ss:$2 sm:$0xff] %v386_v0 }
  0xb0   : > { %v365_v8 = vld.sshfl [vmem:[#allocation1] sm:$0xff pattern:$0x75316420]  ;;  %v366_v9 = vld.sshfl [vmem:[#allocation1 + $0x8] sm:$0xff pattern:$0x75316420] }
  0xb1   : > { %369 = vst [vmem:[#allocation3 + $0x88] sm:$0xf] %v365_v8  ;;  %v394_v12 = vld.sshfl [vmem:[#allocation1 + $0x10] sm:$0xff pattern:$0x75316420] }
  0xb2   : > { %370 = vst [vmem:[#allocation3 + $0x40] sm:$0xf] %v366_v9  ;;  %399 = vrot.lane.b32.xlu2 %v394_v12, %s676_s30 }
  0xb3   : > { %389 = vst [vmem:[#allocation1] ss:$2 sm:$0xff] %v385_v11 }
  0xb4   : > { %427 = vst [vmem:[#allocation1 + $0x10] ss:$2 sm:$0xff] %v422_v10 }
  0xb8   : > { %v510_v20 = vld [vmem:[#allocation3 + $0x88] sm:$0xff] }
  0xb9   : > { %v511_v16 = vld [vmem:[#allocation3 + $0x40] sm:$0xff] }
  0xba   : > { %v393_v17 = vld.sshfl [vmem:[#allocation1 + $0x8] sm:$0xff pattern:$0x75316420]  ;;  %v392_v18 = vld.sshfl [vmem:[#allocation1] sm:$0xff pattern:$0x75316420] }
  0xbb   : > { %v430_v19 = vld.sshfl [vmem:[#allocation1 + $0x10] sm:$0xff pattern:$0x75316420]  ;;  %397 = vrot.lane.b32.xlu1 %v393_v17, %s676_s30  ;;  %395 = vrot.lane.b32.xlu0 %v392_v18, %s676_s30  ;;  %425 = vst [vmem:[#allocation1] ss:$2 sm:$0xff] %v421_v14 }
  0xbc   : > { %435 = vrot.lane.b32.xlu2 %v430_v19, %s678_s6  ;;  %449 = vst [vmem:[#allocation1 + $0x10] ss:$2 sm:$0xff] %v444_v15 }
  0xc2   : > { %v429_v23 = vld.sshfl [vmem:[#allocation1 + $0x8] sm:$0xff pattern:$0x75316420]  ;;  %v428_v24 = vld.sshfl [vmem:[#allocation1] sm:$0xff pattern:$0x75316420] }
  0xc3   : > { %v452_v25 = vld.sshfl [vmem:[#allocation1 + $0x10] sm:$0xff pattern:$0x75316420]  ;;  %433 = vrot.lane.b32.xlu1 %v429_v23, %s678_s6  ;;  %431 = vrot.lane.b32.xlu0 %v428_v24, %s678_s6  ;;  %447 = vst [vmem:[#allocation1] ss:$2 sm:$0xff] %v761_v31 }
  0xc4   : > { %457 = vrot.lane.b32.xlu2 %v452_v25, %s682_s13  ;;  %486 = vst [vmem:[#allocation1 + $0x10] ss:$2 sm:$0xff] %v481_v22 }
  0xca   : > { %v451_v28 = vld.sshfl [vmem:[#allocation1 + $0x8] sm:$0xff pattern:$0x75316420]  ;;  %v450_v29 = vld.sshfl [vmem:[#allocation1] sm:$0xff pattern:$0x75316420] }
  0xcb   : > { %v489_v30 = vld.sshfl [vmem:[#allocation1 + $0x10] sm:$0xff pattern:$0x75316420]  ;;  %455 = vrot.lane.b32.xlu1 %v451_v28, %s682_s13  ;;  %453 = vrot.lane.b32.xlu0 %v450_v29, %s682_s13  ;;  %484 = vst [vmem:[#allocation1] ss:$2 sm:$0xff] %v480_v27 }
  0xcc   : > { %494 = vrot.lane.b32.xlu2 %v489_v30, %s675_s27 }
  0xd2   : > { %v488_v32 = vld.sshfl [vmem:[#allocation1 + $0x8] sm:$0xff pattern:$0x75316420]  ;;  %v487_v33 = vld.sshfl [vmem:[#allocation1] sm:$0xff pattern:$0x75316420] }
  0xd3   : > { %492 = vrot.lane.b32.xlu1 %v488_v32, %s675_s27  ;;  %490 = vrot.lane.b32.xlu0 %v487_v33, %s675_s27 }
  0xd4   : > { %353 = vrot.lane.b32.xlu2 %v348_v3, %s679_s7 }
  0xdb   : > { %351 = vrot.lane.b32.xlu1 %v347_v2, %s679_s7  ;;  %349 = vrot.lane.b32.xlu0 %v346_v1, %s679_s7  ;;  %v684_v1 = vmov 0  }
  0xdc   : > { %253 = vrot.lane.b32.xlu2 %v765_v40, %s680_s8  ;;  %666 = vset.pattern.permute.xlu0 %v684_v1 }
  0xe3   : > { %251 = vrot.lane.b32.xlu1 %v769_v44, %s680_s8  ;;  %249 = vrot.lane.b32.xlu0 %v767_v43, %s680_s8 }
  0xe4   : > { %276 = vrot.lane.b32.xlu2 %v776_v53, %s683_s14 }
  0xeb   : > { %274 = vrot.lane.b32.xlu1 %v774_v52, %s683_s14  ;;  %272 = vrot.lane.b32.xlu0 %v772_v51, %s683_s14 }
  0xf3   : > { %534 = vperm.xlu0 %666, %v531_v61  }
  0xfc   : > { %v316_v31 = vpop.permute.xlu2 %315 }
 0x10c   : > { %v400_v38 = vpop.permute.xlu2 %399 }
 0x113   : > { %v314_v34 = vpop.permute.xlu1 %313  ;;  %v312_v35 = vpop.permute.xlu0 %311 }
 0x114   : > { %v319_v36 = vsel %vm317_vm7, %v314_v34, %v316_v31  ;;  %v318_v37 = vsel %vm317_vm7, %v312_v35, %v314_v34 }
 0x115   : > { %323 = vst [vmem:[#allocation3 + $0x8] sm:$0xf] %v319_v36 }
 0x116   : > { %322 = vst [vmem:[#allocation3 + $0x20] sm:$0xf] %v318_v37  ;;  %v436_v39 = vpop.permute.xlu2 %435 }
 0x11c   : > { %v507_v27 = vld [vmem:[#allocation3 + $0x8] sm:$0xff] }
 0x11d   : > { %v506_v28 = vld [vmem:[#allocation3 + $0x20] sm:$0xff] }
 0x11e   : > { %v458_v44 = vpop.permute.xlu2 %457 }
 0x126   : > { %v495_v53 = vpop.permute.xlu2 %494 }
 0x12d   : > { %v398_v40 = vpop.permute.xlu1 %397  ;;  %v396_v41 = vpop.permute.xlu0 %395 }
 0x12e   : > { %v402_v42 = vsel %vm335_vm5, %v398_v40, %v400_v38  ;;  %v401_v43 = vsel %vm335_vm5, %v396_v41, %v398_v40  ;;  %v354_v58 = vpop.permute.xlu2 %353  ;;  %v530_v41 = vld [vmem:[%s840_s1] sm:$0xf] }
 0x12f   : > { %406 = vst [vmem:[#allocation3 + $0x28] sm:$0xf] %v402_v42 }
 0x130   : > { %405 = vst [vmem:[#allocation3 + $0x50] sm:$0xf] %v401_v43 }
 0x135   : > { %v434_v45 = vpop.permute.xlu1 %433  ;;  %v432_v46 = vpop.permute.xlu0 %431 }
 0x136   : > { %v438_v47 = vsel %vm297_vm4, %v434_v45, %v436_v39  ;;  %v437_v48 = vsel %vm297_vm4, %v432_v46, %v434_v45  ;;  %v254_v9 = vpop.permute.xlu2 %253  ;;  %v513_v17 = vld [vmem:[#allocation3 + $0x28] sm:$0xff] }
 0x137   : > { %442 = vst [vmem:[#allocation3 + $0x48] sm:$0xf] %v438_v47  ;;  %v512_v21 = vld [vmem:[#allocation3 + $0x50] sm:$0xff]  ;;  %v525_v22 = vpack.c.bf16 %v513_v17, %v511_v16 }
 0x138   : > { %441 = vst [vmem:[#allocation3 + $0x10] sm:$0xf] %v437_v48  ;;  %v524_v23 = vpack.c.bf16 %v512_v21, %v510_v20 }
 0x13d   : > { %v456_v49 = vpop.permute.xlu1 %455  ;;  %v454_v50 = vpop.permute.xlu0 %453 }
 0x13e   : > { %v461_v51 = vsel %vm459_vm9, %v456_v49, %v458_v44  ;;  %v460_v52 = vsel %vm459_vm9, %v454_v50, %v456_v49  ;;  %v515_v10 = vld [vmem:[#allocation3 + $0x48] sm:$0xff]  ;;  %v277_v26 = vpop.permute.xlu2 %276 }
 0x13f   : > { %465 = vst [vmem:[#allocation3 + $0x18] sm:$0xf] %v461_v51  ;;  %v514_v11 = vld [vmem:[#allocation3 + $0x10] sm:$0xff] }
 0x140   : > { %464 = vst [vmem:[#allocation3 + $0x30] sm:$0xf] %v460_v52 }
 0x145   : > { %v493_v54 = vpop.permute.xlu1 %492  ;;  %v491_v55 = vpop.permute.xlu0 %490 }
 0x146   : > { %v497_v56 = vsel %vm235_vm3, %v493_v54, %v495_v53  ;;  %v496_v57 = vsel %vm235_vm3, %v491_v55, %v493_v54  ;;  %v517_v6 = vld [vmem:[#allocation3 + $0x18] sm:$0xff] }
 0x147   : > { %501 = vst [vmem:[#allocation3 + $0x60] sm:$0xf] %v497_v56  ;;  %v516_v8 = vld [vmem:[#allocation3 + $0x30] sm:$0xff]  ;;  %v527_v12 = vpack.c.bf16 %v517_v6, %v515_v10 }
 0x148   : > { %500 = vst [vmem:[#allocation3 + $0x68] sm:$0xf] %v496_v57  ;;  %v526_v15 = vpack.c.bf16 %v516_v8, %v514_v11 }
 0x14d   : > { %v352_v59 = vpop.permute.xlu1 %351  ;;  %v350_v60 = vpop.permute.xlu0 %349 }
 0x14e   : > { %v357_v62 = vsel %vm355_vm6, %v352_v59, %v354_v58  ;;  %v356_v63 = vsel %vm355_vm6, %v350_v60, %v352_v59  ;;  %v519_v0 = vld [vmem:[#allocation3 + $0x60] sm:$0xff] }
 0x14f   : > { %361 = vst [vmem:[#allocation3 + $0x80] sm:$0xf] %v357_v62  ;;  %v518_v2 = vld [vmem:[#allocation3 + $0x68] sm:$0xff]  ;;  %v529_v3 = vpack.c.bf16 %v519_v0, %v519_v0 }
 0x150   : > { %360 = vst [vmem:[#allocation3 + $0x70] sm:$0xf] %v356_v63  ;;  %v528_v4 = vpack.c.bf16 %v518_v2, %v518_v2 }
 0x151   : > { %v545_v5 = vsel %vm200_vm0, %v529_v3, 0 }
 0x152   : > { %v542_v7 = vsel %vm200_vm0, %v528_v4, 0  ;;  %563 = vmatpush.bf16.msra.mxu1 %v545_v5 }
 0x153   : > { %550 = vmatpush.bf16.msra.mxu0 %v542_v7 }
 0x155   : > { %v252_v13 = vpop.permute.xlu1 %251  ;;  %v250_v14 = vpop.permute.xlu0 %249 }
 0x156   : > { %v257_v18 = vsel %vm255_vm8, %v252_v13, %v254_v9  ;;  %v256_v19 = vsel %vm255_vm8, %v250_v14, %v252_v13  ;;  %564 = vmatpush.bf16.msra.mxu1 %v527_v12  ;;  %v509_v24 = vld [vmem:[#allocation3 + $0x80] sm:$0xff] }
 0x157   : > { %261 = vst [vmem:[#allocation3 + $0x38] sm:$0xf] %v257_v18  ;;  %551 = vmatpush.bf16.msra.mxu0 %v526_v15  ;;  %v508_v25 = vld [vmem:[#allocation3 + $0x70] sm:$0xff]  ;;  %v523_v29 = vpack.c.bf16 %v509_v24, %v507_v27 }
 0x158   : > { %260 = vst [vmem:[#allocation3] sm:$0xf] %v256_v19  ;;  %v522_v33 = vpack.c.bf16 %v508_v25, %v506_v28 }
 0x15a   : > { %565 = vmatpush.bf16.msra.mxu1 %v525_v22 }
 0x15b   : > { %552 = vmatpush.bf16.msra.mxu0 %v524_v23 }
 0x15d   : > { %v275_v30 = vpop.permute.xlu1 %274  ;;  %v273_v32 = vpop.permute.xlu0 %272 }
 0x15e   : > { %v280_v31 = vsel %vm278_vm10, %v275_v30, %v277_v26  ;;  %v279_v34 = vsel %vm278_vm10, %v273_v32, %v275_v30  ;;  %566 = vmatpush.bf16.msra.mxu1 %v523_v29  ;;  %v503_v35 = vld [vmem:[#allocation3 + $0x38] sm:$0xff] }
 0x15f   : > { %284 = vst [vmem:[#allocation3 + $0x58] sm:$0xf] %v280_v31  ;;  %553 = vmatpush.bf16.msra.mxu0 %v522_v33  ;;  %v502_v37 = vld [vmem:[#allocation3] sm:$0xff] }
 0x160   : > { %283 = vst [vmem:[#allocation3 + $0x78] sm:$0xf] %v279_v34 }
 0x165   : > { %v535_v42 = vpop.permute.xlu0 %534 }
 0x166   : > { %v505_v36 = vld [vmem:[#allocation3 + $0x58] sm:$0xff] }
 0x167   : > { %v504_v38 = vld [vmem:[#allocation3 + $0x78] sm:$0xff]  ;;  %v521_v39 = vpack.c.bf16 %v505_v36, %v503_v35 }
 0x168   : > { %v520_v40 = vpack.c.bf16 %v504_v38, %v502_v37 }
 0x169   : > { %567 = vmatpush.bf16.msra.mxu1 %v521_v39 }
 0x16a   : > { %554 = vmatpush.bf16.msra.mxu0 %v520_v40 }
 0x16c   : > { %643 = vmatmul.msk.bf16.vlgmr.msra.gmra.mxu1 %vm537_vm11, %v530_v41 }
 0x16d   : > { %642 = vmatmul.msk.bf16.vlgmr.msra.gmra.mxu0 %vm537_vm11, %v530_v41 }
 0x1e9   : > { %v569_v43 = vpop.f32.mrf.mxu1 }
 0x1ea   : > { %v570_v44 = vadd.f32 %v569_v43, %v535_v42  ;;  %v556_v45 = vpop.f32.mrf.mxu0 }
 0x1eb   : > { %v557_v46 = vadd.f32 %v556_v45, %v535_v42 }
 0x1ed   : > { %v573_v47 = vpack.c.bf16 %v570_v44, %v557_v46 }
 0x1ef   : > { %574 = vst [vmem:[%s197_s23] sm:$0xff] %v573_v47 }
 0x1f1   : > { %v571_v48 = vpop.f32.mrf.mxu1 }
 0x1f2   : > { %v558_v49 = vpop.f32.mrf.mxu0 }
 0x1f3 PF: > { %s14_s15 = sadd.s32 1, %s673_s15  }
 0x1f4   : > { %p11_p4 = scmp.ge.s32.totalorder %s14_s15, 4  }
 0x1f6   :  { %13 = sbr.rel (!%p11_p4) target bundleno = 1 (0x1), region = 75 }

</bundles_post_ra>
